<compile_context>
chip_gen: v6e
topology: v6e:2x2x1
jax: 0.10.0
libtpu: 0.0.40
codegen_flags: <defaults>
</compile_context>

<pallas_src>
import jax
import jax.numpy as jnp
from jax.experimental import pallas as pl
from jax.experimental.pallas import tpu as pltpu

_LANE = 128
_MAX_TILE_LANES = 32768          # generous lane ceiling; real cap is bytes-based


def _pwdp_kernel(x_ref, k_ref, o_ref):
    # x_ref: (B, c, T), k_ref: (B, cout, c), o_ref: (B, cout, T)
    # f32 accumulation on the MXU; cast back to the output dtype on store.
    # (Default matmul precision; Mosaic's f32 path is accurate for this use.
    #  Pass precision=lax.Precision.HIGHEST here only if bitwise parity with an
    #  f32 reference matters for very large c.)
    o_ref[...] = jnp.einsum(
        "bkc,bct->bkt", k_ref[...], x_ref[...],
        preferred_element_type=jnp.float32,
    ).astype(o_ref.dtype)


def _vmem_plan():
    """Generation-aware VMEM limit and per-step flow budget (bytes)."""
    try:
        cap = int(pltpu.get_tpu_info().vmem_capacity_bytes)
    except Exception:
        cap = 64 * 1024 * 1024                     # conservative (v7x-sized)
    vmem_limit = int(cap * 0.75)                   # headroom for Mosaic scratch
    # ~16 MiB on v7x (64 MiB VMEM), ~32 MiB on v5e/v6e (128 MiB VMEM).
    flow_budget = max(8 * 1024 * 1024, min(32 * 1024 * 1024, vmem_limit // 3))
    return vmem_limit, flow_budget


def _plan_tiles(n, c, cout, hw, itemsize, flow_budget):
    """Pick (batch_block, pixel_tile, num_pixel_tiles)."""
    # Double-buffered x + out tile traffic per pixel.
    per_pixel = 2 * (c + cout) * itemsize
    t_cap = flow_budget // max(per_pixel, 1)
    t_cap = max(_LANE, min(t_cap, _MAX_TILE_LANES))

    if hw <= t_cap:
        # One pixel tile covers the whole image (block last dim == full hw, so
        # no lane alignment/padding is needed).  Block batches instead to
        # amortize the fixed per-grid-step cost.
        t_hw = hw
        num_hw_tiles = 1
        per_image = 2 * ((c + cout) * hw + cout * c) * itemsize
        b_blk = max(1, min(n, flow_budget // max(per_image, 1)))
        while b_blk > 1 and n % b_blk:             # keep batch blocks exact
            b_blk -= 1
    else:
        # Stream lane-aligned pixel tiles; the last (ragged) tile is masked by
        # Pallas -- no host-side padding or output slicing required.
        t_hw = (t_cap // _LANE) * _LANE
        num_hw_tiles = pl.cdiv(hw, t_hw)
        b_blk = 1
    return b_blk, t_hw, num_hw_tiles


def pixel_wise_dot_product(x, K, *, tile_hw=None):
    """x: (n, c, h, w), K: (n, cout, c) -> (n, cout, h, w)."""
    n, c, h, w = x.shape
    nk, cout, ck = K.shape
    assert n == nk
    assert c == ck, (
        "Number of channels in x and Embedding dimension (at dim 2) of K "
        "matrix must match"
    )

    hw = h * w
    out_dtype = jnp.result_type(x.dtype, K.dtype)
    itemsize = max(jnp.dtype(x.dtype).itemsize, jnp.dtype(out_dtype).itemsize)
    vmem_limit, flow_budget = _vmem_plan()

    if tile_hw is not None and int(tile_hw) < hw:
        # Manual tile override (testing / tuning).
        t_hw = max(_LANE, (int(tile_hw) // _LANE) * _LANE)
        num_hw_tiles = pl.cdiv(hw, t_hw)
        b_blk = 1
    else:
        b_blk, t_hw, num_hw_tiles = _plan_tiles(
            n, c, cout, hw, itemsize, flow_budget)

    x_flat = x.reshape(n, c, hw)
    grid = (pl.cdiv(n, b_blk), num_hw_tiles)

    bytes_accessed = (
        n * c * hw * jnp.dtype(x.dtype).itemsize
        + n * cout * c * jnp.dtype(K.dtype).itemsize
        + n * cout * hw * jnp.dtype(out_dtype).itemsize
    )

    out_flat = pl.pallas_call(
        _pwdp_kernel,
        out_shape=jax.ShapeDtypeStruct((n, cout, hw), out_dtype),
        grid_spec=pltpu.PrefetchScalarGridSpec(
            num_scalar_prefetch=0,
            grid=grid,
            in_specs=[
                # x: stream pixel tiles along the inner grid axis.
                pl.BlockSpec((b_blk, c, t_hw), lambda b, p: (b, 0, p)),
                # K: block index constant along the pixel-tile axis
                # -> stays resident in VMEM over the inner grid axis.
                pl.BlockSpec((b_blk, cout, c), lambda b, p: (b, 0, 0)),
            ],
            out_specs=pl.BlockSpec((b_blk, cout, t_hw), lambda b, p: (b, 0, p)),
        ),
        compiler_params=pltpu.CompilerParams(
            dimension_semantics=("parallel", "parallel"),
            vmem_limit_bytes=vmem_limit,
        ),
        cost_estimate=pl.CostEstimate(
            flops=2 * n * cout * c * hw,
            transcendentals=0,
            bytes_accessed=int(bytes_accessed),
        ),
    )(x_flat, K)

    return out_flat.reshape(n, cout, h, w)


if __name__ == "__main__":
    key = jax.random.PRNGKey(0)
    kx, kk, kx2, kk2, kx3, kk3 = jax.random.split(key, 6)

    # Small shapes consistent with the module's forward.
    n, c, h, w = 2, 4, 16, 16
    cout = 8
    x = jax.random.normal(kx, (n, c, h, w), dtype=jnp.float32)
    K = jax.random.normal(kk, (n, cout, c), dtype=jnp.float32)
    out = jax.block_until_ready(pixel_wise_dot_product(x, K))
    ref = jnp.einsum("nchw,nkc->nkhw", x, K)
    assert out.shape == (n, cout, h, w)
    assert jnp.allclose(out, ref, atol=1e-5, rtol=1e-5)

    # Non-lane-aligned spatial size (hw = 63): single full-extent pixel tile,
    # no host-side padding.
    h2, w2 = 9, 7
    x2 = jax.random.normal(kx2, (n, c, h2, w2), dtype=jnp.float32)
    K2 = jax.random.normal(kk2, (n, cout, c), dtype=jnp.float32)
    out2 = jax.block_until_ready(pixel_wise_dot_product(x2, K2))
    ref2 = jnp.einsum("nchw,nkc->nkhw", x2, K2)
    assert out2.shape == (n, cout, h2, w2)
    assert jnp.allclose(out2, ref2, atol=1e-5, rtol=1e-5)

    # Multi-tile path with a ragged (masked) last pixel tile (hw = 320, tile 128).
    h3, w3 = 16, 20
    x3 = jax.random.normal(kx3, (1, c, h3, w3), dtype=jnp.float32)
    K3 = jax.random.normal(kk3, (1, cout, c), dtype=jnp.float32)
    out3 = jax.block_until_ready(pixel_wise_dot_product(x3, K3, tile_hw=128))
    ref3 = jnp.einsum("nchw,nkc->nkhw", x3, K3)
    assert out3.shape == (1, cout, h3, w3)
    assert jnp.allclose(out3, ref3, atol=1e-5, rtol=1e-5)

    print("KERNEL_OK")
</pallas_src>

<mosaic_0001>
module attributes {stable_mosaic.version = 11 : i64} {
  func.func @_pwdp_kernel(%arg0: i32, %arg1: i32, %arg2: memref<2x4x256xf32, #tpu.memory_space<vmem>>, %arg3: memref<2x8x4xf32, #tpu.memory_space<vmem>>, %arg4: memref<2x8x256xf32, #tpu.memory_space<vmem>>) attributes {dimension_semantics = [#tpu.dimension_semantics<parallel>, #tpu.dimension_semantics<parallel>], iteration_bounds = array<i64: 1, 1>, scalar_prefetch = 0 : i64, scratch_operands = 0 : i64, tpu.core_type = #tpu.core_type<tc>, window_params = [{transform_indices = @transform_0, window_bounds = array<i64: 2, 4, 256>}, {transform_indices = @transform_1, window_bounds = array<i64: 2, 8, 4>}, {transform_indices = @transform_2, window_bounds = array<i64: 2, 8, 256>}]} {
    %c0 = arith.constant 0 : index
    %c0_0 = arith.constant 0 : index
    %c0_1 = arith.constant 0 : index
    %0 = vector.load %arg3[%c0, %c0_0, %c0_1] : memref<2x8x4xf32, #tpu.memory_space<vmem>>, vector<2x8x4xf32>
    %c0_2 = arith.constant 0 : index
    %c0_3 = arith.constant 0 : index
    %c0_4 = arith.constant 0 : index
    %1 = vector.load %arg2[%c0_2, %c0_3, %c0_4] : memref<2x4x256xf32, #tpu.memory_space<vmem>>, vector<2x4x256xf32>
    "tpu.trace_start"() <{level = 10 : i32, message = "bkc,bct->bkt"}> : () -> ()
    %cst = arith.constant dense<0.000000e+00> : vector<2x8x256xf32>
    %2 = tpu.matmul %0, %1, %cst {dimension_numbers = #tpu.dot_dimension_numbers<[2], [1], [1], [2], [0, 0, 0, 1, 1, 2], [0], [0]>} : vector<2x8x4xf32>, vector<2x4x256xf32>, vector<2x8x256xf32> -> vector<2x8x256xf32>
    "tpu.trace_stop"() : () -> ()
    %c0_5 = arith.constant 0 : index
    %c0_6 = arith.constant 0 : index
    %c0_7 = arith.constant 0 : index
    %3 = vector.load %arg4[%c0_5, %c0_6, %c0_7] : memref<2x8x256xf32, #tpu.memory_space<vmem>>, vector<2x8x256xf32>
    tpu.vector_store %arg4[%c0_5, %c0_6, %c0_7], %2 {strides = array<i32>} : memref<2x8x256xf32, #tpu.memory_space<vmem>>, vector<2x8x256xf32>,
    return
  }
  func.func @transform_0(%arg0: i32, %arg1: i32) -> (i32, i32, i32) {
    %c0_i32 = arith.constant 0 : i32
    %c0_i32_0 = arith.constant 0 : i32
    return %arg0, %c0_i32, %arg1 : i32, i32, i32
  }
  func.func @transform_1(%arg0: i32, %arg1: i32) -> (i32, i32, i32) {
    %c0_i32 = arith.constant 0 : i32
    %c0_i32_0 = arith.constant 0 : i32
    %c0_i32_1 = arith.constant 0 : i32
    return %arg0, %c0_i32, %c0_i32_0 : i32, i32, i32
  }
  func.func @transform_2(%arg0: i32, %arg1: i32) -> (i32, i32, i32) {
    %c0_i32 = arith.constant 0 : i32
    %c0_i32_0 = arith.constant 0 : i32
    return %arg0, %c0_i32, %arg1 : i32, i32, i32
  }
}

</mosaic_0001>

<bundles_post_ra>
// kernel: tpu_custom_call.1
= control target key start
LH: loop header
LB: loop body
LE: loop exit
PB: predicated region body
PF: predicated region fallthrough
CT: control target
= control target key end

     0   :  { %vm22_vm0 = vcmask 1043456   ;;  %v232_v4 = vmov 0.0   ;;  %s266_s0 = inlined_call_operand.vmem [shape: f32[2,4,256], index: 0, kind: input, shape index: {}]   ;;  %s267_s1 = inlined_call_operand.vmem [shape: f32[2,8,4], index: 1, kind: input, shape index: {}]   ;;  %s268_s2 = inlined_call_operand.hbm [shape: f32[2,8,256], index: 2, kind: output, shape index: {}]  }
   0x1   :  { %v14_v0 = vld [vmem:[%s266_s0] sm:$0xff]  ;;  %v15_v1 = vld [vmem:[%s266_s0 + $0x8] sm:$0xff]  ;;  %91 = vmatprep.mubr.f32.mxu0 %v232_v4  ;;  %171 = vmatprep.mubr.f32.mxu1 %v232_v4 }
   0x2   :  { %v17_v2 = vcombine.high %v14_v0, %v14_v0  ;;  %v99_v3 = vcombine.high %v15_v1, %v15_v1 }
   0x3   :  { %7 = vsyncpa [#allocation3], 0  ;;  %v12_v5 = vld [vmem:[%s267_s1] sm:$0xff]  ;;  %vm18_vm1 = vcmask 31744   ;;  %v13_v6 = vld [vmem:[%s267_s1 + $0x8] sm:$0xff]  ;;  %s233_s0 = smov [#allocation2]  }
   0x4   :  { %198 = vmatprep.subr.msk.mxu0 %vm22_vm0, %v17_v2  ;;  %201 = vmatprep.subr.msk.mxu1 %vm22_vm0, %v99_v3  ;;  %s187_s17 = sshll.u32 %s233_s0, 4  ;;  %s188_s17 = int_to_ptr.vmem [resolvable:$true] %s187_s17 }
   0x5   :  { %199 = vmatpush1.msk.msra.mxu0 %vm22_vm0, %v14_v0  ;;  %202 = vmatpush1.msk.msra.mxu1 %vm22_vm0, %v15_v1  ;;  %s210_s18 = scalar_lea.vmem %s188_s17, 512  ;;  %p215_p1 = scmp.lt.s32.totalorder %s188_s17, %s188_s17 }
   0x6   :  { %200 = vmatmul.mubr.msk.f32.vlgmr.msra.gmra.mxu0 %vm18_vm1, %v12_v5  ;;  %203 = vmatmul.mubr.msk.f32.vlgmr.msra.gmra.mxu1 %vm18_vm1, %v13_v6  ;;  %p211_p0 = scmp.ne.s32.totalorder %s188_s17, %s210_s18  ;;  %p216_p2 = scmp.lt.s32.totalorder %s210_s18, %s210_s18 }
   0x8   :  { %p217_p3 = por %p216_p2, %p215_p1 }
   0xa   :  { %p218_p4 = pnand %p217_p3, %p211_p0 }
  0xc6   :  { %v93_v7 = vpop.f32.mrf.mxu0  ;;  %v173_v8 = vpop.f32.mrf.mxu1 }
  0xc7   :  { %178 = vst [vmem:[#allocation2] sm:$0xff] %v93_v7  ;;  %180 = vst [vmem:[#allocation2 + $0x10] sm:$0xff] %v173_v8 }
  0xc8   :  { %v95_v9 = vpop.f32.mrf.mxu0  ;;  %v175_v10 = vpop.f32.mrf.mxu1 }
  0xc9   :  { %179 = vst [vmem:[#allocation2 + $0x8] sm:$0xff] %v95_v9  ;;  %181 = vst [vmem:[#allocation2 + $0x18] sm:$0xff] %v175_v10 }
  0xca   :  { %221 = shalt.err (!%p218_p4)
}
  0xcb   :  { %s234_s1 = smov 256   ;;  %s235_s19 = smov 16  }
  0xcc   :  { %193 = dma.vmem_to_hbm [thread:$0]  %s188_s17, 512, %s268_s2, [#allocation3], %s234_s1, %s234_s1, %s235_s19  }
  0xcd   :  { %230 = dma.done.wait [#allocation3], 512  }
  0xce   :  { %231 = vsyncadd [#allocation3], 4294966784 }
  0xcf   :  { %197 = vsyncpa [#allocation3], 1 }

</bundles_post_ra>
